<compile_context>
chip_gen: v7x
topology: tpu7x:2x2x1
jax: 0.10.0
libtpu: 0.0.40
codegen_flags: <defaults>
</compile_context>

<pallas_src>
import functools

import jax
import jax.numpy as jnp
from jax.experimental import pallas as pl
from jax.experimental.pallas import tpu as pltpu

_LANE = 128
_SUBLANE = 8


def _round_up(x, m):
    return ((x + m - 1) // m) * m


def _linear_mse_kernel(x_t_ref, w_ref, y_t_ref, b_ref,
                       y_pred_ref, loss_ref, *, tile_n, n_valid):
    """One N-tile of  y^T = w^T @ X^T + b  plus running sum-of-squared-error.

    Layouts (all lane-dense, N on the lane axis):
      x_t_ref    : (D_pad, TILE_N)  tile of X^T             (VMEM)
      w_ref      : (D_pad, 1)       weight column, resident (VMEM, same block)
      y_t_ref    : (1, TILE_N)      tile of y_true^T        (VMEM)
      b_ref      : (1,)             bias scalar             (SMEM)
      y_pred_ref : (1, TILE_N)      tile of y_pred^T        (VMEM out)
      loss_ref   : (1, 1)           resident accumulator -> final MSE
    """
    i = pl.program_id(0)

    @pl.when(i == 0)
    def _init():
        loss_ref[...] = jnp.zeros_like(loss_ref)

    x_t = x_t_ref[...]            # (D_pad, TILE_N) f32
    w = w_ref[...]                # (D_pad, 1)      f32
    b = b_ref[0]                  # scalar f32 from SMEM

    # GEMV on VPU (elementwise mul with lane-broadcast w) + XLU sublane reduce.
    # Padded D rows of X^T / w are zero, so they contribute nothing.
    y = jnp.sum(x_t * w, axis=0, keepdims=True) + b      # (1, TILE_N) lane-dense
    y_pred_ref[...] = y

    # Masked squared error: only global columns < n_valid are real samples.
    col = i * tile_n + jax.lax.broadcasted_iota(jnp.int32, (1, tile_n), 1)
    err = jnp.where(col < n_valid, y - y_t_ref[...], 0.0)
    loss_ref[...] += jnp.sum(err * err, axis=(0, 1), keepdims=True)

    @pl.when(i == pl.num_programs(0) - 1)
    def _finalize():
        loss_ref[...] = loss_ref[...] * (1.0 / n_valid)


def linear_model_forward(x, w, b, y_true):
    """Returns (y_pred [N,1] f32, mse_loss [] f32) matching the torch module."""
    n, d = x.shape
    assert d == w.shape[0], "输入维度与模型参数不匹配"

    x = x.astype(jnp.float32)
    w = w.astype(jnp.float32).reshape(d, 1)
    b = b.astype(jnp.float32).reshape(1)
    y_true = y_true.astype(jnp.float32).reshape(n, 1)

    # Lane-dense layout: N on the 128-lane axis, D on sublanes (padded to 8).
    d_pad = _round_up(d, _SUBLANE)
    tile_n = min(512, _round_up(n, _LANE))     # multiple of 128
    n_pad = _round_up(n, tile_n)
    grid_n = n_pad // tile_n

    x_t = jnp.zeros((d_pad, n_pad), jnp.float32).at[:d, :n].set(x.T)
    w_p = jnp.zeros((d_pad, 1), jnp.float32).at[:d, :].set(w)
    y_t = jnp.zeros((1, n_pad), jnp.float32).at[:, :n].set(y_true.T)

    kernel = functools.partial(_linear_mse_kernel, tile_n=tile_n, n_valid=n)

    y_pred_t, loss = pl.pallas_call(
        kernel,
        out_shape=(
            jax.ShapeDtypeStruct((1, n_pad), jnp.float32),   # y_pred^T (lane-dense)
            jax.ShapeDtypeStruct((1, 1), jnp.float32),       # mse loss
        ),
        grid=(grid_n,),
        in_specs=[
            pl.BlockSpec((d_pad, tile_n), lambda i: (0, i)),        # X^T tile
            pl.BlockSpec((d_pad, 1), lambda i: (0, 0)),             # w (resident)
            pl.BlockSpec((1, tile_n), lambda i: (0, i)),            # y_true^T tile
            pl.BlockSpec(memory_space=pltpu.MemorySpace.SMEM),      # bias scalar
        ],
        out_specs=(
            pl.BlockSpec((1, tile_n), lambda i: (0, i)),            # y_pred^T tile
            pl.BlockSpec((1, 1), lambda i: (0, 0)),                 # loss accumulator
        ),
        compiler_params=pltpu.CompilerParams(
            dimension_semantics=("arbitrary",),   # loss accumulates across N-tiles
            vmem_limit_bytes=32 * 1024 * 1024,
        ),
    )(x_t, w_p, y_t, b)

    y_pred = y_pred_t[0, :n].reshape(n, 1)
    return y_pred, loss[0, 0]


if __name__ == "__main__":
    # Shapes from the module spec.
    N = 2
    input_size = 3

    key = jax.random.PRNGKey(0)
    kx, ky, kw = jax.random.split(key, 3)

    X = jax.random.normal(kx, (N, input_size), dtype=jnp.float32)
    y_true = jax.random.normal(ky, (N, 1), dtype=jnp.float32)
    w = jax.random.normal(kw, (input_size, 1), dtype=jnp.float32)
    b = jnp.zeros((1,), dtype=jnp.float32)

    y_pred, mse_loss = linear_model_forward(X, w, b, y_true)
    jax.block_until_ready((y_pred, mse_loss))

    y_ref = X @ w + b
    loss_ref = jnp.mean((y_ref - y_true) ** 2)
    assert y_pred.shape == (N, 1)
    assert jnp.allclose(y_pred, y_ref, atol=1e-5)
    assert jnp.allclose(mse_loss, loss_ref, atol=1e-5)

    # Larger case: exercises the multi-tile N grid, D/N padding and the
    # masked remainder handling in the loss accumulation.
    N2, D2 = 1030, 7
    k1, k2, k3, k4 = jax.random.split(jax.random.PRNGKey(1), 4)
    X2 = jax.random.normal(k1, (N2, D2), dtype=jnp.float32)
    y2 = jax.random.normal(k2, (N2, 1), dtype=jnp.float32)
    w2 = jax.random.normal(k3, (D2, 1), dtype=jnp.float32)
    b2 = jax.random.normal(k4, (1,), dtype=jnp.float32)

    yp2, l2 = linear_model_forward(X2, w2, b2, y2)
    jax.block_until_ready((yp2, l2))
    y2_ref = X2 @ w2 + b2
    l2_ref = jnp.mean((y2_ref - y2) ** 2)
    assert yp2.shape == (N2, 1)
    assert jnp.allclose(yp2, y2_ref, atol=1e-4)
    assert jnp.allclose(l2, l2_ref, atol=1e-4, rtol=1e-4)

    print("KERNEL_OK")
</pallas_src>

<mosaic_0001>
module attributes {stable_mosaic.version = 11 : i64} {
  func.func @_linear_mse_kernel(%arg0: i32, %arg1: memref<8x128xf32, #tpu.memory_space<vmem>>, %arg2: memref<8x1xf32, #tpu.memory_space<vmem>>, %arg3: memref<1x128xf32, #tpu.memory_space<vmem>>, %arg4: memref<1xf32, #tpu.memory_space<smem>>, %arg5: memref<1x128xf32, #tpu.memory_space<vmem>>, %arg6: memref<1x1xf32, #tpu.memory_space<vmem>>) attributes {dimension_semantics = [#tpu.dimension_semantics<arbitrary>], iteration_bounds = array<i64: 1>, scalar_prefetch = 0 : i64, scratch_operands = 0 : i64, tpu.core_type = #tpu.core_type<tc>, window_params = [{transform_indices = @transform_0, window_bounds = array<i64: 8, 128>}, {pipeline_mode = #tpu.pipeline_mode<synchronous>, transform_indices = @transform_1, window_bounds = array<i64: 8, 1>}, {transform_indices = @transform_2, window_bounds = array<i64: 1, 128>}, {transform_indices = @transform_3, window_bounds = array<i64: 1>}, {transform_indices = @transform_4, window_bounds = array<i64: 1, 128>}, {pipeline_mode = #tpu.pipeline_mode<synchronous>, transform_indices = @transform_5, window_bounds = array<i64: 1, 1>}]} {
    %c0_i32 = arith.constant 0 : i32
    %0 = arith.cmpi eq, %arg0, %c0_i32 : i32
    %1 = arith.extui %0 : i1 to i32
    %c0_i32_0 = arith.constant 0 : i32
    %2 = arith.cmpi ne, %1, %c0_i32_0 : i32
    scf.if %2 {
      %cst_17 = arith.constant 0.000000e+00 : f32
      %35 = vector.broadcast %cst_17 : f32 to vector<1x1xf32>
      %c0_18 = arith.constant 0 : index
      %c0_19 = arith.constant 0 : index
      %36 = vector.load %arg6[%c0_18, %c0_19] : memref<1x1xf32, #tpu.memory_space<vmem>>, vector<1x1xf32>
      tpu.vector_store %arg6[%c0_18, %c0_19], %35 {strides = array<i32>} : memref<1x1xf32, #tpu.memory_space<vmem>>, vector<1x1xf32>,
    } else {
    }
    %c0 = arith.constant 0 : index
    %c0_1 = arith.constant 0 : index
    %3 = vector.load %arg1[%c0, %c0_1] : memref<8x128xf32, #tpu.memory_space<vmem>>, vector<8x128xf32>
    %c0_2 = arith.constant 0 : index
    %c0_3 = arith.constant 0 : index
    %4 = vector.load %arg2[%c0_2, %c0_3] : memref<8x1xf32, #tpu.memory_space<vmem>>, vector<8x1xf32>
    %c0_4 = arith.constant 0 : index
    %5 = memref.load %arg4[%c0_4] : memref<1xf32, #tpu.memory_space<smem>>
    %6 = vector.broadcast %4 : vector<8x1xf32> to vector<8x128xf32>
    %7 = arith.mulf %3, %6 : vector<8x128xf32>
    %cst = arith.constant dense<0.000000e+00> : vector<128xf32>
    %8 = vector.multi_reduction <add>, %7, %cst [0] : vector<8x128xf32> to vector<128xf32>
    %9 = vector.shape_cast %8 : vector<128xf32> to vector<1x128xf32>
    %10 = vector.broadcast %5 : f32 to vector<1x128xf32>
    %11 = arith.addf %9, %10 : vector<1x128xf32>
    %c0_5 = arith.constant 0 : index
    %c0_6 = arith.constant 0 : index
    %12 = vector.load %arg5[%c0_5, %c0_6] : memref<1x128xf32, #tpu.memory_space<vmem>>, vector<1x128xf32>
    tpu.vector_store %arg5[%c0_5, %c0_6], %11 {strides = array<i32>} : memref<1x128xf32, #tpu.memory_space<vmem>>, vector<1x128xf32>,
    %c128_i32 = arith.constant 128 : i32
    %13 = arith.muli %arg0, %c128_i32 : i32
    %14 = tpu.iota {dimensions = array<i32: 1>} : vector<1x128xi32>
    %15 = vector.broadcast %13 : i32 to vector<1x128xi32>
    %16 = arith.addi %15, %14 : vector<1x128xi32>
    %c2_i32 = arith.constant 2 : i32
    %17 = vector.broadcast %c2_i32 : i32 to vector<1x128xi32>
    %18 = arith.cmpi slt, %16, %17 : vector<1x128xi32>
    %c0_7 = arith.constant 0 : index
    %c0_8 = arith.constant 0 : index
    %19 = vector.load %arg3[%c0_7, %c0_8] : memref<1x128xf32, #tpu.memory_space<vmem>>, vector<1x128xf32>
    %20 = arith.subf %11, %19 : vector<1x128xf32>
    %cst_9 = arith.constant 0.000000e+00 : f32
    %21 = vector.broadcast %cst_9 : f32 to vector<1x128xf32>
    %22 = arith.select %18, %20, %21 : vector<1x128xi1>, vector<1x128xf32>
    %c0_10 = arith.constant 0 : index
    %c0_11 = arith.constant 0 : index
    %23 = vector.load %arg6[%c0_10, %c0_11] : memref<1x1xf32, #tpu.memory_space<vmem>>, vector<1x1xf32>
    %24 = arith.mulf %22, %22 : vector<1x128xf32>
    %25 = vector.shape_cast %24 : vector<1x128xf32> to vector<1x1x128xf32>
    %cst_12 = arith.constant dense<0.000000e+00> : vector<1xf32>
    %26 = vector.multi_reduction <add>, %25, %cst_12 [1, 2] : vector<1x1x128xf32> to vector<1xf32>
    %27 = vector.shape_cast %26 : vector<1xf32> to vector<1x1x1xf32>
    %28 = vector.extract %27[0, 0, 0] : f32 from vector<1x1x1xf32>
    %29 = vector.broadcast %28 : f32 to vector<1x1xf32>
    %30 = arith.addf %23, %29 : vector<1x1xf32>
    %c0_13 = arith.constant 0 : index
    %c0_14 = arith.constant 0 : index
    %31 = vector.load %arg6[%c0_13, %c0_14] : memref<1x1xf32, #tpu.memory_space<vmem>>, vector<1x1xf32>
    tpu.vector_store %arg6[%c0_13, %c0_14], %30 {strides = array<i32>} : memref<1x1xf32, #tpu.memory_space<vmem>>, vector<1x1xf32>,
    %c0_i32_15 = arith.constant 0 : i32
    %32 = arith.cmpi eq, %arg0, %c0_i32_15 : i32
    %33 = arith.extui %32 : i1 to i32
    %c0_i32_16 = arith.constant 0 : i32
    %34 = arith.cmpi ne, %33, %c0_i32_16 : i32
    scf.if %34 {
      %c0_17 = arith.constant 0 : index
      %c0_18 = arith.constant 0 : index
      %35 = vector.load %arg6[%c0_17, %c0_18] : memref<1x1xf32, #tpu.memory_space<vmem>>, vector<1x1xf32>
      %cst_19 = arith.constant 5.000000e-01 : f32
      %36 = vector.broadcast %cst_19 : f32 to vector<1x1xf32>
      %37 = arith.mulf %35, %36 : vector<1x1xf32>
      %c0_20 = arith.constant 0 : index
      %c0_21 = arith.constant 0 : index
      %38 = vector.load %arg6[%c0_20, %c0_21] : memref<1x1xf32, #tpu.memory_space<vmem>>, vector<1x1xf32>
      tpu.vector_store %arg6[%c0_20, %c0_21], %37 {strides = array<i32>} : memref<1x1xf32, #tpu.memory_space<vmem>>, vector<1x1xf32>,
    } else {
    }
    return
  }
  func.func @transform_0(%arg0: i32) -> (i32, i32) {
    %c0_i32 = arith.constant 0 : i32
    %c0_i32_0 = arith.constant 0 : i32
    return %c0_i32, %arg0 : i32, i32
  }
  func.func @transform_1(%arg0: i32) -> (i32, i32) {
    %c0_i32 = arith.constant 0 : i32
    %c0_i32_0 = arith.constant 0 : i32
    %c0_i32_1 = arith.constant 0 : i32
    return %c0_i32, %c0_i32_0 : i32, i32
  }
  func.func @transform_2(%arg0: i32) -> (i32, i32) {
    %c0_i32 = arith.constant 0 : i32
    %c0_i32_0 = arith.constant 0 : i32
    return %c0_i32, %arg0 : i32, i32
  }
  func.func @transform_3(%arg0: i32) -> i32 {
    %c0_i32 = arith.constant 0 : i32
    %c0_i32_0 = arith.constant 0 : i32
    return %c0_i32 : i32
  }
  func.func @transform_4(%arg0: i32) -> (i32, i32) {
    %c0_i32 = arith.constant 0 : i32
    %c0_i32_0 = arith.constant 0 : i32
    return %c0_i32, %arg0 : i32, i32
  }
  func.func @transform_5(%arg0: i32) -> (i32, i32) {
    %c0_i32 = arith.constant 0 : i32
    %c0_i32_0 = arith.constant 0 : i32
    %c0_i32_1 = arith.constant 0 : i32
    return %c0_i32, %c0_i32_0 : i32, i32
  }
}

</mosaic_0001>

<bundles_post_ra>
// kernel: tpu_custom_call.1
= control target key start
LH: loop header
LB: loop body
LE: loop exit
PB: predicated region body
PF: predicated region fallthrough
CT: control target
= control target key end

     0   :  { %12 = vsyncpa [#allocation4], 0  ;;  %s234_s0 = inlined_call_operand.vmem [shape: f32[8,128], index: 0, kind: input, shape index: {}]   ;;  %s235_s1 = inlined_call_operand.vmem [shape: f32[8,1], index: 1, kind: input, shape index: {}]   ;;  %s236_s2 = inlined_call_operand.vmem [shape: f32[1,128], index: 2, kind: input, shape index: {}]   ;;  %s237_s3 = inlined_call_operand.<no memory space> [shape: f32[1], index: 3, kind: input, shape index: {}]   ;;  %s238_s4 = inlined_call_operand.hbm [shape: f32[1,128], index: 4, kind: output, shape index: {0}]   ;;  %s239_s5 = inlined_call_operand.hbm [shape: f32[1,1], index: 5, kind: output, shape index: {1}]  }
   0x1   :  { %v29_v0 = vld [vmem:[%s235_s1] sm:$0xff] }
   0x2   :  { %13 = vsyncpa [#allocation6], 0  ;;  %v161_v1 = vmov 0   ;;  %v28_v2 = vld [vmem:[%s234_s0] sm:$0xff]  ;;  %v47_v8 = vlaneseq  ;;  %v43_v11 = vstv %s237_s3  ;;  %vm57_vm1 = vcmask 1040384   ;;  %s163_s0 = smov [#allocation3]  }
   0x3   :  { %112 = vset.pattern.permute.xlu0 %v161_v1  ;;  %v52_v14 = vld [vmem:[%s236_s2] sm:$0x1]  ;;  %vm26_vm2 = vcmask 0   ;;  %v162_v20 = vmov 0.0   ;;  %s84_s3 = sshll.u32 %s163_s0, 4  ;;  %s85_s3 = int_to_ptr.vmem [resolvable:$true] %s84_s3 }
   0x4   :  { %33 = vperm.xlu0 %112, %v29_v0   ;;  %v48_v12 = vand.u32 127, %v47_v8  ;;  %27 = vst.msk [vmem:[#allocation5] sm:$0x1] %vm26_vm2, %v162_v20  ;;  %s113_s25 = scalar_lea.vmem %s85_s3, 16  ;;  %s117_s26 = scalar_lea.vmem %s85_s3, 32 }
   0x5   :  { %p114_p0 = scmp.ne.s32.totalorder %s85_s3, %s113_s25  ;;  %p118_p1 = scmp.lt.s32.totalorder %s85_s3, %s85_s3 }
   0x6   :  { %vm51_vm0 = vcmp.lt.s32.totalorder %v48_v12, 2  ;;  %p119_p2 = scmp.lt.s32.totalorder %s117_s26, %s113_s25 }
   0x8   :  { %p120_p3 = por %p119_p2, %p118_p1 }
   0xa   :  { %p121_p4 = pnand %p120_p3, %p114_p0 }
  0x83   :  { %v34_v3 = vpop.permute.xlu0 %33 }
  0x84   :  { %v36_v4 = vmul.f32 %v34_v3, %v28_v2 }
  0x86   :  { %v37_v5 = vrot.slane %v36_v4, 4 }
  0x88   :  { %v38_v6 = vadd.f32 %v37_v5, %v36_v4 }
  0x8a   :  { %v39_v7 = vrot.slane %v38_v6, 2 }
  0x8c   :  { %v40_v9 = vadd.f32 %v39_v7, %v38_v6 }
  0x8e   :  { %v41_v10 = vrot.slane %v40_v9, 1 }
  0x90   :  { %v42_v13 = vadd.f32 %v41_v10, %v40_v9 }
  0x92   :  { %v44_v15 = vadd.f32 %v43_v11, %v42_v13 }
  0x94   :  { %v53_v16 = vsub.f32 %v44_v15, %v52_v14  ;;  %45 = vst [vmem:[#allocation3] sm:$0x1] %v44_v15 }
  0x96   :  { %v54_v17 = vsel %vm51_vm0, %v53_v16, 0.0 }
  0x97   :  { %v56_v18 = vmul.f32 %v54_v17, %v54_v17 }
  0x99   :  { %v58_v19 = vsel %vm57_vm1, %v56_v18, 0.0 }
  0x9a   :  { %59 = vadd.xlane.f32.xlu0 %v58_v19 }
  0x9b   :  { %124 = shalt.err (!%p121_p4)
}
  0x9c   :  { %s125_s28 = scalar_lea.hbm %s238_s4, 16 }
  0x9d   :  { %p126_p5 = scmp.ne.s32.totalorder %s238_s4, %s125_s28  ;;  %p129_p6 = scmp.lt.u32.totalorder %s125_s28, %s238_s4 }
  0x9f   :  { %p131_p7 = pnand %p129_p6, %p126_p5 }
  0xa1   :  { %134 = shalt.err (!%p131_p7)
}
  0xa2   :  { %87 = dma.vmem_to_hbm [thread:$0]  %s85_s3, 16, %s238_s4, [#allocation4]   ;;  %v55_v28 = vld [vmem:[#allocation5] sm:$0x1] }
  0xa3   :  { %s164_s11 = smov [#allocation5]  }
  0xa4   :  { %s94_s12 = sshll.u32 %s164_s11, 4  ;;  %s95_s12 = int_to_ptr.vmem [resolvable:$true] %s94_s12 }
  0xa5   :  { %s135_s4 = scalar_lea.vmem %s95_s12, 16  ;;  %s139_s13 = scalar_lea.vmem %s95_s12, 32 }
  0xa6   :  { %p136_p8 = scmp.ne.s32.totalorder %s95_s12, %s135_s4  ;;  %p140_p9 = scmp.lt.s32.totalorder %s95_s12, %s95_s12 }
  0xa7   :  { %p141_p10 = scmp.lt.s32.totalorder %s139_s13, %s135_s4 }
  0xa9   :  { %p142_p11 = por %p141_p10, %p140_p9 }
  0xab   :  { %p143_p12 = pnand %p142_p11, %p136_p8 }
 0x127   :  { %v60_v21 = vpop.xlane.xlu0 %59 }
 0x128   :  { %v61_v22 = vrot.slane %v60_v21, 4 }
 0x12a   :  { %v62_v23 = vadd.f32 %v61_v22, %v60_v21 }
 0x12c   :  { %v63_v24 = vrot.slane %v62_v23, 2 }
 0x12e   :  { %v64_v25 = vadd.f32 %v63_v24, %v62_v23 }
 0x130   :  { %v65_v26 = vrot.slane %v64_v25, 1 }
 0x132   :  { %v66_v27 = vadd.f32 %v65_v26, %v64_v25 }
 0x134   :  { %106 = vpush %v66_v27 }
 0x165   :  { %s107_s10 = spop %106 }
 0x166   :  { %v68_v29 = vstv %s107_s10 }
 0x167   :  { %v69_v30 = vadd.f32 %v68_v29, %v55_v28 }
 0x169   :  { %71 = vst.msk [vmem:[#allocation5] sm:$0x1] %vm26_vm2, %v69_v30 }
 0x170   :  { %v75_v31 = vld [vmem:[#allocation5] sm:$0x1] }
 0x171   :  { %v76_v32 = vmul.f32 0.5, %v75_v31 }
 0x173   :  { %77 = vst.msk [vmem:[#allocation5] sm:$0x1] %vm26_vm2, %v76_v32 }
 0x174   :  { %146 = shalt.err (!%p143_p12)
}
 0x175   :  { %s147_s16 = scalar_lea.hbm %s239_s5, 16 }
 0x176   :  { %p148_p13 = scmp.ne.s32.totalorder %s239_s5, %s147_s16  ;;  %p151_p0 = scmp.lt.u32.totalorder %s147_s16, %s239_s5 }
 0x178   :  { %p153_p1 = pnand %p151_p0, %p148_p13 }
 0x17a   :  { %156 = shalt.err (!%p153_p1)
}
 0x17b   :  { %97 = dma.vmem_to_hbm [thread:$0]  %s95_s12, 16, %s239_s5, [#allocation6]  }
 0x17c   :  { %157 = dma.done.wait [#allocation4], 16  }
 0x17d   :  { %158 = vsyncadd [#allocation4], 4294967280 }
 0x17e   :  { %159 = dma.done.wait [#allocation6], 16  }
 0x17f   :  { %160 = vsyncadd [#allocation6], 4294967280 }
 0x180   :  { %104 = vsyncpa [#allocation4], 1 }
 0x181   :  { %105 = vsyncpa [#allocation6], 1 }

</bundles_post_ra>
